<compile_context>
chip_gen: v5e
topology: v5e:2x2
jax: 0.10.0
libtpu: 0.0.40
codegen_flags: <defaults>
</compile_context>

<pallas_src>
import math

import jax
import jax.numpy as jnp
from jax.experimental import pallas as pl
from jax.experimental.pallas import tpu as pltpu

T_DIM = 16           # time-embedding dim (module default)
ACTION_DIM = 10      # fc4: Linear(10, 128); x.squeeze(1) is (B, 10)
COND_C, COND_H, COND_W = 3, 16, 16
RES_CONV_OC = 16     # stand-in ResNet conv width
CONV_K = COND_C * 9  # 27 im2col taps
CONV_KPAD = 32       # im2col K padded to a sublane multiple
FC4_KPAD = 16        # fc4 input (10) padded to a sublane multiple

# Static 8-aligned row offsets of each weight inside the packed bf16 slab.
W_CONV = 0            # (32, 128)   27 real rows, 16 real out lanes
W_RES = 32            # (128, 128)  16 real rows
W_FC4 = 160           # (16, 128)   10 real rows
W_T1 = 176            # (16, 128)   32 real out lanes
W_T2 = 192            # (128, 128)  32 real rows, 16 real out lanes
W_2A = 320            # (128, 128)  fc2 rows multiplying out1
W_2B = 448            # (128, 128)  fc2 rows multiplying out2
W_2C = 576            # (128, 128)  16 real rows (fc2 rows multiplying t)
W_3 = 704             # (128, 128)  10 real out lanes
W_ROWS = 832

# Bias slab rows (f32, (8, 128)).
B_CONV, B_RES, B_FC4, B_T1, B_T2, B_FC2, B_FC3 = range(7)


# ----------------------------------------------------------------------------
# Single fused Pallas kernel:
#   conv3x3 (im2col matmul) -> ReLU -> GAP (pooling matmul) -> res_fc -> ReLU,
#   fc4 (leaky_relu), time-MLP (Linear/Mish/Linear), split fc2 (leaky_relu), fc3.
# ----------------------------------------------------------------------------
def _lenet_fused_kernel(
    x2col_ref,   # (B*HW, 32) bf16  im2col patches of the padded condition
    xact_ref,    # (B, 16)    bf16  x.squeeze(1) zero-padded 10 -> 16
    te_ref,      # (B, 16)    bf16  sinusoidal time embedding
    w_ref,       # (832, 128) bf16  packed weight slab (see W_* offsets)
    b_ref,       # (8, 128)   f32   packed bias slab
    out_ref,     # (B, 128)   f32   lane-dense output (first 10 lanes valid)
):
    f32, bf16 = jnp.float32, jnp.bfloat16
    b_all = b_ref[...]                                    # (8, 128)
    n_rows = x2col_ref.shape[0]
    batch = xact_ref.shape[0]
    hw = n_rows // batch

    def mm(a, off, rows):
        # Static, 8-aligned slab slice -> single bf16 MXU matmul, f32 accum.
        return jnp.dot(a, w_ref[off:off + rows, :], preferred_element_type=f32)

    # ---- ResNet stand-in: conv3x3 (one K=32 matmul over the whole batch) -> ReLU
    conv = jnp.maximum(mm(x2col_ref[...], W_CONV, CONV_KPAD)
                       + b_all[B_CONV:B_CONV + 1, :], 0.0)          # (B*HW, 128)

    # ---- Global average pool as a (B, B*HW) block-diagonal matmul (mask built
    # in-kernel from iota; runs on VPU, no extra input DMA).
    row_ids = jax.lax.broadcasted_iota(jnp.int32, (batch, n_rows), 0)
    col_ids = jax.lax.broadcasted_iota(jnp.int32, (batch, n_rows), 1)
    lo = row_ids * hw
    pool = jnp.where((col_ids >= lo) & (col_ids < lo + hw),
                     1.0 / hw, 0.0).astype(bf16)                    # (B, B*HW)
    gap = jnp.dot(pool, conv.astype(bf16), preferred_element_type=f32)  # (B, 128)

    # ---- res_fc -> ReLU  (rows 16.. of the slab slice are zero padding)
    out1 = jnp.maximum(mm(gap.astype(bf16), W_RES, 128)
                       + b_all[B_RES:B_RES + 1, :], 0.0)            # (B, 128)

    # ---- fc4 branch: leaky_relu(x @ W4 + b4)
    out2 = mm(xact_ref[...], W_FC4, FC4_KPAD) + b_all[B_FC4:B_FC4 + 1, :]
    out2 = jnp.where(out2 >= 0, out2, 0.01 * out2)                  # (B, 128)

    # ---- time MLP: Linear -> Mish -> Linear (sin/cos embedding arrives via te_ref)
    th = mm(te_ref[...], W_T1, T_DIM) + b_all[B_T1:B_T1 + 1, :]
    th = th * jnp.tanh(jax.nn.softplus(th))                         # Mish (f32)
    tv = mm(th.astype(bf16), W_T2, 128) + b_all[B_T2:B_T2 + 1, :]   # (B, 128)

    # ---- fc2 as split matmuls over the (out1, out2, t) concat + leaky_relu
    h = (mm(out1.astype(bf16), W_2A, 128)
         + mm(out2.astype(bf16), W_2B, 128)
         + mm(tv.astype(bf16), W_2C, 128)
         + b_all[B_FC2:B_FC2 + 1, :])
    h = jnp.where(h >= 0, h, 0.01 * h)

    # ---- fc3 (zero-padded to 128 output lanes -> lane-dense store; only HBM write)
    out_ref[...] = (mm(h.astype(bf16), W_3, 128)
                    + b_all[B_FC3:B_FC3 + 1, :]).astype(out_ref.dtype)


# ----------------------------------------------------------------------------
# Cheap XLA glue (layout only; no network activation ever round-trips HBM).
# ----------------------------------------------------------------------------
def _im2col(cond):
    """(B, C, H, W) -> (B*H*W, 32) bf16 3x3/pad=1 patches, K ordered (c, dy, dx)."""
    B, C, H, W = cond.shape
    xp = jnp.pad(cond, ((0, 0), (0, 0), (1, 1), (1, 1)))          # (B, C, H+2, W+2)
    taps = [xp[:, :, dy:dy + H, dx:dx + W] for dy in range(3) for dx in range(3)]
    patches = jnp.stack(taps, axis=2)                              # (B, C, 9, H, W)
    patches = patches.reshape(B, C * 9, H * W)
    patches = jnp.transpose(patches, (0, 2, 1)).reshape(B * H * W, C * 9)
    patches = jnp.pad(patches, ((0, 0), (0, CONV_KPAD - C * 9)))
    return patches.astype(jnp.bfloat16)


def sinusoidal_pos_emb(t, dim):
    half = dim // 2
    scale = math.log(10000.0) / (half - 1)
    freqs = jnp.exp(jnp.arange(half, dtype=jnp.float32) * -scale)
    emb = t[:, None] * freqs[None, :]
    return jnp.concatenate([jnp.sin(emb), jnp.cos(emb)], axis=-1)


# ----------------------------------------------------------------------------
# Parameters (deterministic, PyTorch-Linear-style uniform +-1/sqrt(fan_in)),
# packed at init into one bf16 weight slab + one f32 bias slab so all layout
# work is free at runtime.
# ----------------------------------------------------------------------------
def _linear_params(key, fan_in, fan_out):
    kw, kb = jax.random.split(key)
    bound = 1.0 / math.sqrt(fan_in)
    w = jax.random.uniform(kw, (fan_in, fan_out), jnp.float32, -bound, bound)
    b = jax.random.uniform(kb, (1, fan_out), jnp.float32, -bound, bound)
    return w, b


def init_params(key):
    keys = jax.random.split(key, 8)

    # TODO(synk): ResNet18 is referenced but not defined in the provided source;
    # stand-in = conv3x3(pad=1) -> ReLU -> global-avg-pool -> Linear(16, 128) -> ReLU,
    # which produces the 128-dim feature the concat in forward() requires.
    kcw, kcb = jax.random.split(keys[0])
    cb = 1.0 / math.sqrt(CONV_K)
    wc = jax.random.uniform(kcw, (RES_CONV_OC, COND_C, 3, 3), jnp.float32, -cb, cb)
    bc = jax.random.uniform(kcb, (RES_CONV_OC,), jnp.float32, -cb, cb)
    wconv = jnp.transpose(wc.reshape(RES_CONV_OC, CONV_K))        # (27, 16)

    wres, bres = _linear_params(keys[1], RES_CONV_OC, 128)
    # fc1 (Linear(16*5*5, 128)) exists in __init__ but is unused in forward().
    w4, b4 = _linear_params(keys[2], ACTION_DIM, 128)
    wt1, bt1 = _linear_params(keys[3], T_DIM, T_DIM * 2)
    wt2, bt2 = _linear_params(keys[4], T_DIM * 2, T_DIM)
    w2, b2 = _linear_params(keys[5], 256 + T_DIM, 128)
    w3, b3 = _linear_params(keys[6], 128, ACTION_DIM)

    def pad_w(w, rows):
        r, c = w.shape
        return jnp.pad(w, ((0, rows - r), (0, 128 - c)))

    w_slab = jnp.concatenate([
        pad_w(wconv, 32),            # W_CONV
        pad_w(wres, 128),            # W_RES
        pad_w(w4, FC4_KPAD),         # W_FC4
        pad_w(wt1, T_DIM),           # W_T1
        pad_w(wt2, 128),             # W_T2
        pad_w(w2[:128], 128),        # W_2A
        pad_w(w2[128:256], 128),     # W_2B
        pad_w(w2[256:], 128),        # W_2C
        pad_w(w3, 128),              # W_3 (output lanes padded 10 -> 128)
    ], axis=0).astype(jnp.bfloat16)
    assert w_slab.shape == (W_ROWS, 128)

    def pad_b(b):
        return jnp.pad(b, ((0, 0), (0, 128 - b.shape[1])))

    b_slab = jnp.concatenate([
        pad_b(bc.reshape(1, -1)), pad_b(bres), pad_b(b4),
        pad_b(bt1), pad_b(bt2), pad_b(b2), pad_b(b3),
        jnp.zeros((1, 128), jnp.float32),
    ], axis=0)                                                     # (8, 128)
    return {"w_slab": w_slab, "b_slab": b_slab}


# ----------------------------------------------------------------------------
# Forward pass (mirrors LeNet.forward) — one pallas_call total.
# ----------------------------------------------------------------------------
@jax.jit
def lenet_forward(params, x, condition, t):
    B = x.shape[0]
    xact = jnp.squeeze(x, axis=1)                                  # (B, 10)
    xact = jnp.pad(xact, ((0, 0), (0, FC4_KPAD - ACTION_DIM))).astype(jnp.bfloat16)
    # TODO(synk): sin/cos of the 16-dim time embedding stays in XLA glue (2x8
    # elements); the Linear -> Mish -> Linear part of time_mlp is fully in-kernel.
    te = sinusoidal_pos_emb(t, T_DIM).astype(jnp.bfloat16)         # (B, 16)
    x2col = _im2col(condition)                                     # (B*256, 32) bf16

    # NOTE: at production batch sizes, add a leading batch grid axis with
    # dimension_semantics=("parallel",) so v7x's 2 TensorCores split the work,
    # and re-derive VMEM tiling for v7x's 64 MiB VMEM. At B=2 everything
    # (<0.5 MiB total) fits trivially in one invocation.
    out = pl.pallas_call(
        _lenet_fused_kernel,
        out_shape=jax.ShapeDtypeStruct((B, 128), jnp.float32),
        in_specs=[pl.BlockSpec(memory_space=pltpu.MemorySpace.VMEM)] * 5,
        out_specs=pl.BlockSpec(memory_space=pltpu.MemorySpace.VMEM),
    )(x2col, xact, te, params["w_slab"], params["b_slab"])
    return out[:, :ACTION_DIM]                                     # (B, 10)


if __name__ == "__main__":
    key = jax.random.PRNGKey(0)
    kp, kx, kc, kt = jax.random.split(key, 4)

    params = init_params(kp)

    B = 2
    x = jax.random.normal(kx, (B, 1, ACTION_DIM), jnp.float32)           # (2, 1, 10)
    condition = jax.random.normal(kc, (B, COND_C, COND_H, COND_W),
                                  jnp.float32)                           # (2, 3, 16, 16)
    t = jnp.arange(B, dtype=jnp.float32) + 1.0                           # (2,)

    out = lenet_forward(params, x, condition, t)
    jax.block_until_ready(out)
    assert out.shape == (B, ACTION_DIM) and out.dtype == jnp.float32
    assert bool(jnp.all(jnp.isfinite(out)))
    print("KERNEL_OK")
</pallas_src>

<mosaic_0001>
module attributes {stable_mosaic.version = 11 : i64} {
  func.func @_lenet_fused_kernel(%arg0: memref<512x32xbf16, #tpu.memory_space<vmem>>, %arg1: memref<2x16xbf16, #tpu.memory_space<vmem>>, %arg2: memref<2x16xbf16, #tpu.memory_space<vmem>>, %arg3: memref<832x128xbf16, #tpu.memory_space<vmem>>, %arg4: memref<8x128xf32, #tpu.memory_space<vmem>>, %arg5: memref<2x128xf32, #tpu.memory_space<vmem>>) attributes {dimension_semantics = [], scalar_prefetch = 0 : i64, scratch_operands = 0 : i64, tpu.core_type = #tpu.core_type<tc>} {
    %c0 = arith.constant 0 : index
    %c0_0 = arith.constant 0 : index
    %0 = vector.load %arg4[%c0, %c0_0] : memref<8x128xf32, #tpu.memory_space<vmem>>, vector<8x128xf32>
    %c0_1 = arith.constant 0 : index
    %c0_2 = arith.constant 0 : index
    %1 = vector.load %arg0[%c0_1, %c0_2] : memref<512x32xbf16, #tpu.memory_space<vmem>>, vector<512x32xbf16>
    %c0_3 = arith.constant 0 : index
    %c0_4 = arith.constant 0 : index
    %2 = vector.load %arg3[%c0_3, %c0_4] : memref<832x128xbf16, #tpu.memory_space<vmem>>, vector<32x128xbf16>
    %cst = arith.constant dense<0.000000e+00> : vector<512x128xf32>
    %3 = tpu.matmul %1, %2, %cst {dimension_numbers = #tpu.dot_dimension_numbers<[1], [0], [0], [1], [0, 0, 1, 1], [], []>} : vector<512x32xbf16>, vector<32x128xbf16>, vector<512x128xf32> -> vector<512x128xf32>
    %4 = vector.extract_strided_slice %0 {offsets = [0, 0], sizes = [1, 128], strides = [1, 1]} : vector<8x128xf32> to vector<1x128xf32>
    %5 = vector.broadcast %4 : vector<1x128xf32> to vector<512x128xf32>
    %6 = arith.addf %3, %5 : vector<512x128xf32>
    %cst_5 = arith.constant 0.000000e+00 : f32
    %7 = vector.broadcast %cst_5 : f32 to vector<512x128xf32>
    %8 = arith.maximumf %6, %7 : vector<512x128xf32>
    %9 = tpu.iota {dimensions = array<i32: 0>} : vector<2x512xi32>
    %10 = tpu.iota {dimensions = array<i32: 1>} : vector<2x512xi32>
    %c256_i32 = arith.constant 256 : i32
    %11 = vector.broadcast %c256_i32 : i32 to vector<2x512xi32>
    %12 = arith.muli %9, %11 : vector<2x512xi32>
    %13 = arith.cmpi sge, %10, %12 : vector<2x512xi32>
    %c256_i32_6 = arith.constant 256 : i32
    %14 = vector.broadcast %c256_i32_6 : i32 to vector<2x512xi32>
    %15 = arith.addi %12, %14 : vector<2x512xi32>
    %16 = arith.cmpi slt, %10, %15 : vector<2x512xi32>
    %17 = arith.andi %13, %16 : vector<2x512xi1>
    %cst_7 = arith.constant 3.906250e-03 : f32
    %cst_8 = arith.constant 0.000000e+00 : f32
    %18 = vector.broadcast %cst_7 : f32 to vector<2x512xf32>
    %19 = vector.broadcast %cst_8 : f32 to vector<2x512xf32>
    %20 = arith.select %17, %18, %19 : vector<2x512xi1>, vector<2x512xf32>
    %21 = arith.truncf %20 : vector<2x512xf32> to vector<2x512xbf16>
    %22 = arith.truncf %8 : vector<512x128xf32> to vector<512x128xbf16>
    %cst_9 = arith.constant dense<0.000000e+00> : vector<2x128xf32>
    %23 = tpu.matmul %21, %22, %cst_9 {dimension_numbers = #tpu.dot_dimension_numbers<[1], [0], [0], [1], [0, 0, 1, 1], [], []>} : vector<2x512xbf16>, vector<512x128xbf16>, vector<2x128xf32> -> vector<2x128xf32>
    %24 = arith.truncf %23 : vector<2x128xf32> to vector<2x128xbf16>
    %c32 = arith.constant 32 : index
    %c0_10 = arith.constant 0 : index
    %25 = vector.load %arg3[%c32, %c0_10] : memref<832x128xbf16, #tpu.memory_space<vmem>>, vector<128x128xbf16>
    %cst_11 = arith.constant dense<0.000000e+00> : vector<2x128xf32>
    %26 = tpu.matmul %24, %25, %cst_11 {dimension_numbers = #tpu.dot_dimension_numbers<[1], [0], [0], [1], [0, 0, 1, 1], [], []>} : vector<2x128xbf16>, vector<128x128xbf16>, vector<2x128xf32> -> vector<2x128xf32>
    %27 = vector.extract_strided_slice %0 {offsets = [1, 0], sizes = [1, 128], strides = [1, 1]} : vector<8x128xf32> to vector<1x128xf32>
    %28 = vector.broadcast %27 : vector<1x128xf32> to vector<2x128xf32>
    %29 = arith.addf %26, %28 : vector<2x128xf32>
    %cst_12 = arith.constant 0.000000e+00 : f32
    %30 = vector.broadcast %cst_12 : f32 to vector<2x128xf32>
    %31 = arith.maximumf %29, %30 : vector<2x128xf32>
    %c0_13 = arith.constant 0 : index
    %c0_14 = arith.constant 0 : index
    %32 = vector.load %arg1[%c0_13, %c0_14] : memref<2x16xbf16, #tpu.memory_space<vmem>>, vector<2x16xbf16>
    %c160 = arith.constant 160 : index
    %c0_15 = arith.constant 0 : index
    %33 = vector.load %arg3[%c160, %c0_15] : memref<832x128xbf16, #tpu.memory_space<vmem>>, vector<16x128xbf16>
    %cst_16 = arith.constant dense<0.000000e+00> : vector<2x128xf32>
    %34 = tpu.matmul %32, %33, %cst_16 {dimension_numbers = #tpu.dot_dimension_numbers<[1], [0], [0], [1], [0, 0, 1, 1], [], []>} : vector<2x16xbf16>, vector<16x128xbf16>, vector<2x128xf32> -> vector<2x128xf32>
    %35 = vector.extract_strided_slice %0 {offsets = [2, 0], sizes = [1, 128], strides = [1, 1]} : vector<8x128xf32> to vector<1x128xf32>
    %36 = vector.broadcast %35 : vector<1x128xf32> to vector<2x128xf32>
    %37 = arith.addf %34, %36 : vector<2x128xf32>
    %cst_17 = arith.constant 0.000000e+00 : f32
    %38 = vector.broadcast %cst_17 : f32 to vector<2x128xf32>
    %39 = arith.cmpf oge, %37, %38 : vector<2x128xf32>
    %cst_18 = arith.constant 0.00999999977 : f32
    %40 = vector.broadcast %cst_18 : f32 to vector<2x128xf32>
    %41 = arith.mulf %40, %37 : vector<2x128xf32>
    %42 = arith.select %39, %37, %41 : vector<2x128xi1>, vector<2x128xf32>
    %c0_19 = arith.constant 0 : index
    %c0_20 = arith.constant 0 : index
    %43 = vector.load %arg2[%c0_19, %c0_20] : memref<2x16xbf16, #tpu.memory_space<vmem>>, vector<2x16xbf16>
    %c176 = arith.constant 176 : index
    %c0_21 = arith.constant 0 : index
    %44 = vector.load %arg3[%c176, %c0_21] : memref<832x128xbf16, #tpu.memory_space<vmem>>, vector<16x128xbf16>
    %cst_22 = arith.constant dense<0.000000e+00> : vector<2x128xf32>
    %45 = tpu.matmul %43, %44, %cst_22 {dimension_numbers = #tpu.dot_dimension_numbers<[1], [0], [0], [1], [0, 0, 1, 1], [], []>} : vector<2x16xbf16>, vector<16x128xbf16>, vector<2x128xf32> -> vector<2x128xf32>
    %46 = vector.extract_strided_slice %0 {offsets = [3, 0], sizes = [1, 128], strides = [1, 1]} : vector<8x128xf32> to vector<1x128xf32>
    %47 = vector.broadcast %46 : vector<1x128xf32> to vector<2x128xf32>
    %48 = arith.addf %45, %47 : vector<2x128xf32>
    %cst_23 = arith.constant 0.000000e+00 : f32
    %49 = vector.broadcast %cst_23 : f32 to vector<2x128xf32>
    %50 = arith.maximumf %48, %49 : vector<2x128xf32>
    %51 = vector.broadcast %cst_23 : f32 to vector<2x128xf32>
    %52 = arith.subf %48, %51 : vector<2x128xf32>
    %53 = arith.cmpf one, %52, %52 : vector<2x128xf32>
    %54 = vector.broadcast %cst_23 : f32 to vector<2x128xf32>
    %55 = arith.addf %48, %54 : vector<2x128xf32>
    %56 = math.absf %52 : vector<2x128xf32>
    %cst_24 = arith.constant 0.000000e+00 : f32
    %57 = vector.broadcast %cst_24 : f32 to vector<2x128xf32>
    %58 = arith.subf %57, %56 : vector<2x128xf32>
    %59 = math.exp %58 : vector<2x128xf32>
    %60 = math.log1p %59 : vector<2x128xf32>
    %61 = arith.addf %50, %60 : vector<2x128xf32>
    %62 = arith.select %53, %55, %61 : vector<2x128xi1>, vector<2x128xf32>
    %63 = math.tanh %62 : vector<2x128xf32>
    %64 = arith.mulf %48, %63 : vector<2x128xf32>
    %65 = arith.truncf %64 : vector<2x128xf32> to vector<2x128xbf16>
    %c192 = arith.constant 192 : index
    %c0_25 = arith.constant 0 : index
    %66 = vector.load %arg3[%c192, %c0_25] : memref<832x128xbf16, #tpu.memory_space<vmem>>, vector<128x128xbf16>
    %cst_26 = arith.constant dense<0.000000e+00> : vector<2x128xf32>
    %67 = tpu.matmul %65, %66, %cst_26 {dimension_numbers = #tpu.dot_dimension_numbers<[1], [0], [0], [1], [0, 0, 1, 1], [], []>} : vector<2x128xbf16>, vector<128x128xbf16>, vector<2x128xf32> -> vector<2x128xf32>
    %68 = vector.extract_strided_slice %0 {offsets = [4, 0], sizes = [1, 128], strides = [1, 1]} : vector<8x128xf32> to vector<1x128xf32>
    %69 = vector.broadcast %68 : vector<1x128xf32> to vector<2x128xf32>
    %70 = arith.addf %67, %69 : vector<2x128xf32>
    %71 = arith.truncf %31 : vector<2x128xf32> to vector<2x128xbf16>
    %c320 = arith.constant 320 : index
    %c0_27 = arith.constant 0 : index
    %72 = vector.load %arg3[%c320, %c0_27] : memref<832x128xbf16, #tpu.memory_space<vmem>>, vector<128x128xbf16>
    %cst_28 = arith.constant dense<0.000000e+00> : vector<2x128xf32>
    %73 = tpu.matmul %71, %72, %cst_28 {dimension_numbers = #tpu.dot_dimension_numbers<[1], [0], [0], [1], [0, 0, 1, 1], [], []>} : vector<2x128xbf16>, vector<128x128xbf16>, vector<2x128xf32> -> vector<2x128xf32>
    %74 = arith.truncf %42 : vector<2x128xf32> to vector<2x128xbf16>
    %c448 = arith.constant 448 : index
    %c0_29 = arith.constant 0 : index
    %75 = vector.load %arg3[%c448, %c0_29] : memref<832x128xbf16, #tpu.memory_space<vmem>>, vector<128x128xbf16>
    %cst_30 = arith.constant dense<0.000000e+00> : vector<2x128xf32>
    %76 = tpu.matmul %74, %75, %cst_30 {dimension_numbers = #tpu.dot_dimension_numbers<[1], [0], [0], [1], [0, 0, 1, 1], [], []>} : vector<2x128xbf16>, vector<128x128xbf16>, vector<2x128xf32> -> vector<2x128xf32>
    %77 = arith.addf %73, %76 : vector<2x128xf32>
    %78 = arith.truncf %70 : vector<2x128xf32> to vector<2x128xbf16>
    %c576 = arith.constant 576 : index
    %c0_31 = arith.constant 0 : index
    %79 = vector.load %arg3[%c576, %c0_31] : memref<832x128xbf16, #tpu.memory_space<vmem>>, vector<128x128xbf16>
    %cst_32 = arith.constant dense<0.000000e+00> : vector<2x128xf32>
    %80 = tpu.matmul %78, %79, %cst_32 {dimension_numbers = #tpu.dot_dimension_numbers<[1], [0], [0], [1], [0, 0, 1, 1], [], []>} : vector<2x128xbf16>, vector<128x128xbf16>, vector<2x128xf32> -> vector<2x128xf32>
    %81 = arith.addf %77, %80 : vector<2x128xf32>
    %82 = vector.extract_strided_slice %0 {offsets = [5, 0], sizes = [1, 128], strides = [1, 1]} : vector<8x128xf32> to vector<1x128xf32>
    %83 = vector.broadcast %82 : vector<1x128xf32> to vector<2x128xf32>
    %84 = arith.addf %81, %83 : vector<2x128xf32>
    %cst_33 = arith.constant 0.000000e+00 : f32
    %85 = vector.broadcast %cst_33 : f32 to vector<2x128xf32>
    %86 = arith.cmpf oge, %84, %85 : vector<2x128xf32>
    %cst_34 = arith.constant 0.00999999977 : f32
    %87 = vector.broadcast %cst_34 : f32 to vector<2x128xf32>
    %88 = arith.mulf %87, %84 : vector<2x128xf32>
    %89 = arith.select %86, %84, %88 : vector<2x128xi1>, vector<2x128xf32>
    %90 = arith.truncf %89 : vector<2x128xf32> to vector<2x128xbf16>
    %c704 = arith.constant 704 : index
    %c0_35 = arith.constant 0 : index
    %91 = vector.load %arg3[%c704, %c0_35] : memref<832x128xbf16, #tpu.memory_space<vmem>>, vector<128x128xbf16>
    %cst_36 = arith.constant dense<0.000000e+00> : vector<2x128xf32>
    %92 = tpu.matmul %90, %91, %cst_36 {dimension_numbers = #tpu.dot_dimension_numbers<[1], [0], [0], [1], [0, 0, 1, 1], [], []>} : vector<2x128xbf16>, vector<128x128xbf16>, vector<2x128xf32> -> vector<2x128xf32>
    %93 = vector.extract_strided_slice %0 {offsets = [6, 0], sizes = [1, 128], strides = [1, 1]} : vector<8x128xf32> to vector<1x128xf32>
    %94 = vector.broadcast %93 : vector<1x128xf32> to vector<2x128xf32>
    %95 = arith.addf %92, %94 : vector<2x128xf32>
    %c0_37 = arith.constant 0 : index
    %c0_38 = arith.constant 0 : index
    %96 = vector.load %arg5[%c0_37, %c0_38] : memref<2x128xf32, #tpu.memory_space<vmem>>, vector<2x128xf32>
    tpu.vector_store %arg5[%c0_37, %c0_38], %95 {strides = array<i32>} : memref<2x128xf32, #tpu.memory_space<vmem>>, vector<2x128xf32>,
    return
  }
}

</mosaic_0001>

<bundles_post_ra>
// kernel: lenet_forward.1
= control target key start
LH: loop header
LB: loop body
LE: loop exit
PB: predicated region body
PF: predicated region fallthrough
CT: control target
= control target key end

     0   :  { %s2272_s0 = inlined_call_operand.vmem [shape: bf16[512,32], index: 0, kind: input, shape index: {}]   ;;  %s2273_s1 = inlined_call_operand.vmem [shape: bf16[2,16], index: 1, kind: input, shape index: {}]   ;;  %s2274_s2 = inlined_call_operand.vmem [shape: bf16[2,16], index: 2, kind: input, shape index: {}]   ;;  %s2275_s3 = inlined_call_operand.vmem [shape: bf16[832,128], index: 3, kind: input, shape index: {}]   ;;  %s2276_s4 = inlined_call_operand.vmem [shape: f32[8,128], index: 4, kind: input, shape index: {}]   ;;  %s2277_s5 = inlined_call_operand.hbm [shape: f32[2,128], index: 5, kind: output, shape index: {}]  }
   0x1   :  { %v1689_v0 = vld [vmem:[%s2275_s3 + $0x8] sm:$0xff]  ;;  %v1688_v1 = vld [vmem:[%s2275_s3] sm:$0xff] }
   0x2   :  { %367 = vmatpush.bf16.msra.mxu0 %v1689_v0  ;;  %1740 = vmatpush.bf16.msra.mxu1 %v1689_v0 }
   0x3   :  { %1741 = vmatpush.bf16.msra.mxu2 %v1689_v0  ;;  %1742 = vmatpush.bf16.msra.mxu3 %v1689_v0 }
   0x4   :  { %10 = vsyncpa [#allocation3], 0  ;;  %v1656_v2 = vld [vmem:[%s2272_s0] sm:$0xff]  ;;  %v1670_v3 = vld [vmem:[%s2272_s0 + $0x70] sm:$0xff]  ;;  %vm264_vm0 = vcmask 261120   ;;  %vm797_vm5 = vcmask 130048  }
   0x5   :  { %v1676_v4 = vld [vmem:[%s2272_s0 + $0xa0] sm:$0xff]  ;;  %v1679_v5 = vld [vmem:[%s2272_s0 + $0xb8] sm:$0xff]  ;;  %v1657_v6 = vld [vmem:[%s2272_s0 + $0x8] sm:$0xff]  ;;  %s1781_s26 = smov [#allocation2]  }
   0x6   :  { %368 = vmatpush.bf16.msra.mxu0 %v1688_v1  ;;  %1743 = vmatpush.bf16.msra.mxu1 %v1688_v1  ;;  %v1671_v7 = vld [vmem:[%s2272_s0 + $0x78] sm:$0xff]  ;;  %v1677_v8 = vld [vmem:[%s2272_s0 + $0xa8] sm:$0xff]  ;;  %v1680_v9 = vld [vmem:[%s2272_s0 + $0xc0] sm:$0xff]  ;;  %s1267_s27 = sshll.u32 %s1781_s26, 4  ;;  %s1268_s27 = int_to_ptr.vmem [resolvable:$true] %s1267_s27 }
   0x7   :  { %1744 = vmatpush.bf16.msra.mxu2 %v1688_v1  ;;  %1745 = vmatpush.bf16.msra.mxu3 %v1688_v1  ;;  %v1658_v10 = vld [vmem:[%s2272_s0 + $0x10] sm:$0xff]  ;;  %v1672_v11 = vld [vmem:[%s2272_s0 + $0x80] sm:$0xff]  ;;  %v1681_v13 = vld [vmem:[%s2272_s0 + $0xc8] sm:$0xff] }
   0x8   :  { %v1678_v12 = vld [vmem:[%s2272_s0 + $0xb0] sm:$0xff]  ;;  %v1659_v14 = vld [vmem:[%s2272_s0 + $0x18] sm:$0xff]  ;;  %v1673_v15 = vld [vmem:[%s2272_s0 + $0x88] sm:$0xff] }
   0x9   :  { %1414 = vmatmul.msk.bf16.vlgmr.msra.gmra.mxu0 %vm264_vm0, %v1656_v2  ;;  %1428 = vmatmul.msk.bf16.vlgmr.msra.gmra.mxu1 %vm264_vm0, %v1670_v3  ;;  %v1682_v16 = vld [vmem:[%s2272_s0 + $0xd0] sm:$0xff]  ;;  %v1660_v17 = vld [vmem:[%s2272_s0 + $0x20] sm:$0xff]  ;;  %v1683_v19 = vld [vmem:[%s2272_s0 + $0xd8] sm:$0xff] }
   0xa   :  { %1434 = vmatmul.msk.bf16.vlgmr.msra.gmra.mxu2 %vm264_vm0, %v1676_v4  ;;  %1437 = vmatmul.msk.bf16.vlgmr.msra.gmra.mxu3 %vm264_vm0, %v1679_v5  ;;  %v1674_v18 = vld [vmem:[%s2272_s0 + $0x90] sm:$0xff]  ;;  %v1661_v20 = vld [vmem:[%s2272_s0 + $0x28] sm:$0xff]  ;;  %v1675_v21 = vld [vmem:[%s2272_s0 + $0x98] sm:$0xff] }
   0xb   :  { %v1684_v22 = vld [vmem:[%s2272_s0 + $0xe0] sm:$0xff]  ;;  %v1662_v23 = vld [vmem:[%s2272_s0 + $0x30] sm:$0xff]  ;;  %v1685_v24 = vld [vmem:[%s2272_s0 + $0xe8] sm:$0xff] }
   0xc   :  { %v1663_v25 = vld [vmem:[%s2272_s0 + $0x38] sm:$0xff]  ;;  %v1686_v26 = vld [vmem:[%s2272_s0 + $0xf0] sm:$0xff]  ;;  %v1664_v27 = vld [vmem:[%s2272_s0 + $0x40] sm:$0xff] }
   0xd   :  { %v1924_v28 = vld [vmem:[%s2276_s4] sm:$0xff]  ;;  %v1687_v31 = vld [vmem:[%s2272_s0 + $0xf8] sm:$0xff]  ;;  %v1665_v44 = vld [vmem:[%s2272_s0 + $0x48] sm:$0xff] }
   0xe   :  { %v1930_v32 = vperm.slane %v1924_v28, 0 }
  0x19   :  { %1415 = vmatmul.msk.bf16.gmra.mxu0 %vm264_vm0, %v1657_v6  ;;  %1429 = vmatmul.msk.bf16.gmra.mxu1 %vm264_vm0, %v1671_v7 }
  0x1a   :  { %1435 = vmatmul.msk.bf16.gmra.mxu2 %vm264_vm0, %v1677_v8  ;;  %1438 = vmatmul.msk.bf16.gmra.mxu3 %vm264_vm0, %v1680_v9  ;;  %v1666_v8 = vld [vmem:[%s2272_s0 + $0x50] sm:$0xff] }
  0x29   :  { %1416 = vmatmul.msk.bf16.gmra.mxu0 %vm264_vm0, %v1658_v10  ;;  %1430 = vmatmul.msk.bf16.gmra.mxu1 %vm264_vm0, %v1672_v11 }
  0x2a   :  { %1436 = vmatmul.msk.bf16.gmra.mxu2 %vm264_vm0, %v1678_v12  ;;  %1439 = vmatmul.msk.bf16.gmra.mxu3 %vm264_vm0, %v1681_v13 }
  0x39   :  { %1417 = vmatmul.msk.bf16.gmra.mxu0 %vm264_vm0, %v1659_v14  ;;  %1431 = vmatmul.msk.bf16.gmra.mxu1 %vm264_vm0, %v1673_v15 }
  0x3a   :  { %1440 = vmatmul.msk.bf16.gmra.mxu3 %vm264_vm0, %v1682_v16 }
  0x49   :  { %1418 = vmatmul.msk.bf16.gmra.mxu0 %vm264_vm0, %v1660_v17  ;;  %1432 = vmatmul.msk.bf16.gmra.mxu1 %vm264_vm0, %v1674_v18 }
  0x4a   :  { %1441 = vmatmul.msk.bf16.gmra.mxu3 %vm264_vm0, %v1683_v19 }
  0x59   :  { %1419 = vmatmul.msk.bf16.gmra.mxu0 %vm264_vm0, %v1661_v20  ;;  %1433 = vmatmul.msk.bf16.gmra.mxu1 %vm264_vm0, %v1675_v21 }
  0x5a   :  { %1442 = vmatmul.msk.bf16.gmra.mxu3 %vm264_vm0, %v1684_v22 }
  0x69   :  { %1420 = vmatmul.msk.bf16.gmra.mxu0 %vm264_vm0, %v1662_v23 }
  0x6a   :  { %1443 = vmatmul.msk.bf16.gmra.mxu3 %vm264_vm0, %v1685_v24 }
  0x79   :  { %1421 = vmatmul.msk.bf16.gmra.mxu0 %vm264_vm0, %v1663_v25 }
  0x7a   :  { %1444 = vmatmul.msk.bf16.gmra.mxu3 %vm264_vm0, %v1686_v26 }
  0x86   :  { %v370_v29 = vpop.f32.mrf.mxu0  ;;  %v440_v30 = vpop.f32.mrf.mxu1 }
  0x87   :  { %v371_v33 = vadd.f32 %v370_v29, %v1930_v32  ;;  %v441_v53 = vadd.f32 %v440_v30, %v1930_v32 }
  0x89   :  { %1422 = vmatmul.msk.bf16.gmra.mxu0 %vm264_vm0, %v1664_v27  ;;  %v530_v39 = vmax.f32 %v371_v33, 0.0  ;;  %v558_v63 = vmax.f32 %v441_v53, 0.0  ;;  %v1667_v33 = vld [vmem:[%s2272_s0 + $0x58] sm:$0xff] }
  0x8a   :  { %1445 = vmatmul.msk.bf16.gmra.mxu3 %vm264_vm0, %v1687_v31 }
  0x8d   :  { %v1935_v34 = vpop.f32.mrf.mxu2  ;;  %v485_v35 = vpop.f32.mrf.mxu3 }
  0x8e   :  { %v372_v36 = vpop.f32.mrf.mxu0  ;;  %v442_v37 = vpop.f32.mrf.mxu1  ;;  %v486_v41 = vadd.f32 %v485_v35, %v1930_v32 }
  0x8f   :  { %v373_v38 = vadd.f32 %v372_v36, %v1930_v32  ;;  %v443_v54 = vadd.f32 %v442_v37, %v1930_v32 }
  0x90   :  { %v576_v46 = vmax.f32 %v486_v41, 0.0 }
  0x91   :  { %v531_v40 = vmax.f32 %v373_v38, 0.0  ;;  %v559_v0 = vmax.f32 %v443_v54, 0.0 }
  0x93   :  { %v1939_v42 = vpack.c.bf16 %v531_v40, %v530_v39  ;;  %v637_v10 = vpack.c.bf16 %v559_v0, %v558_v63  ;;  %v1668_v63 = vld [vmem:[%s2272_s0 + $0x60] sm:$0xff] }
  0x95   :  { %v1941_v43 = vpop.f32.mrf.mxu2  ;;  %v487_v45 = vpop.f32.mrf.mxu3 }
  0x96   :  { %v375_v47 = vpop.f32.mrf.mxu0  ;;  %v445_v48 = vpop.f32.mrf.mxu1  ;;  %v488_v49 = vadd.f32 %v487_v45, %v1930_v32  ;;  %v473_v45 = vadd.f32 %v1941_v43, %v1930_v32 }
  0x97   :  { %v446_v52 = vadd.f32 %v445_v48, %v1930_v32  ;;  %v376_v55 = vadd.f32 %v375_v47, %v1930_v32 }
  0x98   :  { %v577_v50 = vmax.f32 %v488_v49, 0.0  ;;  %v571_v53 = vmax.f32 %v473_v45, 0.0 }
  0x99   :  { %1423 = vmatmul.msk.bf16.gmra.mxu0 %vm264_vm0, %v1665_v44  ;;  %v560_v60 = vmax.f32 %v446_v52, 0.0  ;;  %v532_v1 = vmax.f32 %v376_v55, 0.0  ;;  %v471_v44 = vadd.f32 %v1935_v34, %v1930_v32 }
  0x9a   :  { %v646_v51 = vpack.c.bf16 %v577_v50, %v576_v46 }
  0x9b   :  { %v570_v52 = vmax.f32 %v471_v44, 0.0 }
  0x9c   :  { %681 = vmatpush.bf16.msrb.mxu3 %v646_v51 }
  0x9d   :  { %v475_v56 = vpop.f32.mrf.mxu2  ;;  %v490_v57 = vpop.f32.mrf.mxu3 }
  0x9e   :  { %v377_v58 = vpop.f32.mrf.mxu0  ;;  %v447_v59 = vpop.f32.mrf.mxu1  ;;  %v491_v4 = vadd.f32 %v490_v57, %v1930_v32  ;;  %v476_v29 = vadd.f32 %v475_v56, %v1930_v32 }
  0x9f   :  { %v378_v61 = vadd.f32 %v377_v58, %v1930_v32  ;;  %v448_v62 = vadd.f32 %v447_v59, %v1930_v32  ;;  %v643_v58 = vpack.c.bf16 %v571_v53, %v570_v52 }
  0xa0   :  { %v578_v11 = vmax.f32 %v491_v4, 0.0  ;;  %v572_v46 = vmax.f32 %v476_v29, 0.0 }
  0xa1   :  { %v533_v2 = vmax.f32 %v378_v61, 0.0  ;;  %v561_v3 = vmax.f32 %v448_v62, 0.0 }
  0xa3   :  { %v638_v5 = vpack.c.bf16 %v561_v3, %v560_v60  ;;  %v1955_v6 = vpack.c.bf16 %v533_v2, %v532_v1 }
  0xa5   :  { %v477_v7 = vpop.f32.mrf.mxu2  ;;  %v492_v9 = vpop.f32.mrf.mxu3  ;;  %668 = vmatpush.bf16.msrb.mxu2 %v638_v5 }
  0xa6   :  { %v380_v12 = vpop.f32.mrf.mxu0  ;;  %v1960_v13 = vpop.f32.mrf.mxu1  ;;  %v493_v14 = vadd.f32 %v492_v9, %v1930_v32  ;;  %v478_v30 = vadd.f32 %v477_v7, %v1930_v32 }
  0xa7   :  { %v381_v17 = vadd.f32 %v380_v12, %v1930_v32  ;;  %v1669_v12 = vld [vmem:[%s2272_s0 + $0x68] sm:$0xff]  ;;  %v451_v44 = vadd.f32 %v1960_v13, %v1930_v32 }
  0xa8   :  { %v579_v15 = vmax.f32 %v493_v14, 0.0  ;;  %v573_v47 = vmax.f32 %v478_v30, 0.0 }
  0xa9   :  { %1424 = vmatmul.msk.bf16.gmra.mxu0 %vm264_vm0, %v1666_v8  ;;  %669 = vmatpush.bf16.msrb.mxu2 %v637_v10  ;;  %v534_v23 = vmax.f32 %v381_v17, 0.0 }
  0xaa   :  { %v1964_v16 = vpack.c.bf16 %v579_v15, %v578_v11  ;;  %v644_v54 = vpack.c.bf16 %v573_v47, %v572_v46 }
  0xad   :  { %v480_v18 = vpop.f32.mrf.mxu2  ;;  %v495_v19 = vpop.f32.mrf.mxu3 }
  0xae   :  { %v382_v20 = vpop.f32.mrf.mxu0  ;;  %v1967_v21 = vpop.f32.mrf.mxu1  ;;  %v481_v25 = vadd.f32 %v480_v18, %v1930_v32  ;;  %v496_v26 = vadd.f32 %v495_v19, %v1930_v32 }
  0xaf   :  { %v383_v22 = vadd.f32 %v382_v20, %v1930_v32  ;;  %v453_v45 = vadd.f32 %v1967_v21, %v1930_v32  ;;  %v594_v21 = vlaneseq }
  0xb0   :  { %v574_v36 = vmax.f32 %v481_v25, 0.0  ;;  %v580_v37 = vmax.f32 %v496_v26, 0.0 }
  0xb1   :  { %v535_v24 = vmax.f32 %v383_v22, 0.0  ;;  %v563_v52 = vmax.f32 %v453_v45, 0.0 }
  0xb3   :  { %v1972_v27 = vpack.c.bf16 %v535_v24, %v534_v23 }
  0xb5   :  { %v482_v31 = vpop.f32.mrf.mxu2  ;;  %v497_v35 = vpop.f32.mrf.mxu3 }
  0xb6   :  { %v483_v38 = vadd.f32 %v482_v31, %v1930_v32  ;;  %v385_v39 = vpop.f32.mrf.mxu0  ;;  %v455_v40 = vpop.f32.mrf.mxu1  ;;  %v498_v41 = vadd.f32 %v497_v35, %v1930_v32 }
  0xb7   :  { %v386_v55 = vadd.f32 %v385_v39, %v1930_v32  ;;  %v456_v35 = vadd.f32 %v455_v40, %v1930_v32  ;;  %v562_v40 = vmax.f32 %v451_v44, 0.0 }
  0xb8   :  { %v575_v48 = vmax.f32 %v483_v38, 0.0  ;;  %v581_v49 = vmax.f32 %v498_v41, 0.0 }
  0xb9   :  { %1425 = vmatmul.msk.bf16.gmra.mxu0 %vm264_vm0, %v1667_v33  ;;  %v536_v59 = vmax.f32 %v386_v55, 0.0  ;;  %v564_v46 = vmax.f32 %v456_v35, 0.0 }
  0xba   :  { %v1986_v50 = vpack.c.bf16 %v581_v49, %v580_v37  ;;  %v645_v51 = vpack.c.bf16 %v575_v48, %v574_v36 }
  0xbc   :  { %682 = vmatpush.bf16.msrb.mxu3 %v645_v51 }
  0xbd   :  { %v500_v56 = vpop.f32.mrf.mxu3 }
  0xbe   :  { %v387_v34 = vpop.f32.mrf.mxu0  ;;  %v457_v57 = vpop.f32.mrf.mxu1  ;;  %v501_v61 = vadd.f32 %v500_v56, %v1930_v32 }
  0xbf   :  { %v388_v43 = vadd.f32 %v387_v34, %v1930_v32  ;;  %v458_v36 = vadd.f32 %v457_v57, %v1930_v32  ;;  %v595_v57 = vshrl.u32 %v594_v21, 7 }
  0xc0   :  { %683 = vmatpush.bf16.msrb.mxu3 %v644_v54  ;;  %v582_v1 = vmax.f32 %v501_v61, 0.0  ;;  %v639_v54 = vpack.c.bf16 %v563_v52, %v562_v40 }
  0xc1   :  { %v537_v60 = vmax.f32 %v388_v43, 0.0  ;;  %v565_v47 = vmax.f32 %v458_v36, 0.0  ;;  %v2030_v43 = vand.u32 127, %v594_v21 }
  0xc3   :  { %v1991_v62 = vpack.c.bf16 %v537_v60, %v536_v59  ;;  %v640_v53 = vpack.c.bf16 %v565_v47, %v564_v46  ;;  %v599_v59 = vadd.s32 256, %v2030_v43 }
  0xc4   :  { %684 = vmatpush.bf16.msrb.mxu3 %v643_v58  ;;  %v2032_v58 = vmul.u32 256, %v595_v57 }
  0xc5   :  { %v502_v0 = vpop.f32.mrf.mxu3 }
  0xc6   :  { %v1996_v2 = vpop.f32.mrf.mxu0  ;;  %v460_v3 = vpop.f32.mrf.mxu1  ;;  %v503_v4 = vadd.f32 %v502_v0, %v1930_v32  ;;  %v2036_v60 = vadd.s32 256, %v2032_v58  ;;  %vm604_vm1 = vcmp.ge.s32.totalorder %v599_v59, %v2032_v58  ;;  %vm602_vm6 = vcmp.ge.s32.totalorder %v2030_v43, %v2032_v58 }
  0xc7   :  { %v461_v24 = vadd.f32 %v460_v3, %v1930_v32 }
  0xc8   :  { %v583_v5 = vmax.f32 %v503_v4, 0.0  ;;  %vm609_vm2 = vcmp.lt.s32.totalorder %v599_v59, %v2036_v60  ;;  %v1780_v4 = vmov 0.00390625|0.00390625   ;;  %vm607_vm7 = vcmp.lt.s32.totalorder %v2030_v43, %v2036_v60 }
  0xc9   :  { %1426 = vmatmul.msk.bf16.gmra.mxu0 %vm264_vm0, %v1668_v63  ;;  %v566_v37 = vmax.f32 %v461_v24, 0.0  ;;  %vm613_vm3 = vmand %vm604_vm1, %vm609_vm2 }
  0xca   :  { %v2000_v7 = vpack.c.bf16 %v583_v5, %v582_v1  ;;  %vm1450_vm4 = vmpackc.low %vm613_vm3, %vm613_vm3 }
  0xcb   :  { %vm611_vm8 = vmand %vm602_vm6, %vm607_vm7 }
  0xcc   :  { %vm1446_vm9 = vmpackc.low %vm611_vm8, %vm611_vm8 }
  0xcd   :  { %v505_v8 = vpop.f32.mrf.mxu3 }
  0xce   :  { %v2002_v9 = vpop.f32.mrf.mxu0  ;;  %v462_v10 = vpop.f32.mrf.mxu1  ;;  %v506_v11 = vadd.f32 %v505_v8, %v1930_v32 }
  0xcf   :  { %v463_v25 = vadd.f32 %v462_v10, %v1930_v32 }
  0xd0   :  { %v584_v15 = vmax.f32 %v506_v11, 0.0 }
  0xd1   :  { %v567_v38 = vmax.f32 %v463_v25, 0.0 }
  0xd3   :  { %v641_v48 = vpack.c.bf16 %v567_v38, %v566_v37 }
  0xd5   :  { %v507_v14 = vpop.f32.mrf.mxu3 }
  0xd6   :  { %v395_v17 = vpop.f32.mrf.mxu0  ;;  %v465_v18 = vpop.f32.mrf.mxu1  ;;  %v508_v19 = vadd.f32 %v507_v14, %v1930_v32 }
  0xd7   :  { %v466_v23 = vadd.f32 %v465_v18, %v1930_v32 }
  0xd8   :  { %v585_v20 = vmax.f32 %v508_v19, 0.0 }
  0xd9   :  { %1427 = vmatmul.msk.bf16.gmra.mxu0 %vm264_vm0, %v1669_v12  ;;  %v568_v31 = vmax.f32 %v466_v23, 0.0  ;;  %v393_v23 = vadd.f32 %v2002_v9, %v1930_v32 }
  0xda   :  { %v2010_v22 = vpack.c.bf16 %v585_v20, %v584_v15  ;;  %v396_v15 = vadd.f32 %v395_v17, %v1930_v32  ;;  %v1698_v17 = vld [vmem:[%s2275_s3 + $0x50] sm:$0xff] }
  0xdd   :  { %v2015_v26 = vpop.f32.mrf.mxu3 }
  0xde   :  { %v397_v29 = vpop.f32.mrf.mxu0  ;;  %v467_v30 = vpop.f32.mrf.mxu1 }
  0xdf   :  { %v468_v33 = vadd.f32 %v467_v30, %v1930_v32  ;;  %v398_v11 = vadd.f32 %v397_v29, %v1930_v32  ;;  %v391_v30 = vadd.f32 %v1996_v2, %v1930_v32  ;;  %v787_v2 = vld [vmem:[%s2273_s1] sm:$0x1] }
  0xe1   :  { %v569_v39 = vmax.f32 %v468_v33, 0.0  ;;  %v541_v24 = vmax.f32 %v398_v11, 0.0  ;;  %v539_v33 = vmax.f32 %v393_v23, 0.0  ;;  %v538_v35 = vmax.f32 %v391_v30, 0.0 }
  0xe3   :  { %v642_v41 = vpack.c.bf16 %v569_v39, %v568_v31  ;;  %v540_v31 = vmax.f32 %v396_v15, 0.0  ;;  %v627_v39 = vpack.c.bf16 %v539_v33, %v538_v35 }
  0xe5   :  { %685 = vmatpush.bf16.msrb.mxu3 %v642_v41  ;;  %v2024_v49 = vpop.f32.mrf.mxu3  ;;  %v628_v29 = vpack.c.bf16 %v541_v24, %v540_v31 }
  0xe6   :  { %v400_v51 = vpop.f32.mrf.mxu0 }
  0xe7   :  { %v401_v5 = vadd.f32 %v400_v51, %v1930_v32 }
  0xe9   :  { %686 = vmatpush.bf16.msrb.mxu3 %v641_v48  ;;  %v542_v18 = vmax.f32 %v401_v5, 0.0 }
  0xed   :  { %687 = vmatpush.bf16.msrb.mxu3 %v640_v53  ;;  %v2026_v55 = vpop.f32.mrf.mxu3 }
  0xee   :  { %v402_v56 = vpop.f32.mrf.mxu0 }
  0xef   :  { %v403_v1 = vadd.f32 %v402_v56, %v1930_v32  ;;  %v1699_v56 = vld [vmem:[%s2275_s3 + $0x58] sm:$0xff] }
  0xf1   :  { %688 = vmatpush.bf16.msrb.mxu3 %v639_v54  ;;  %v543_v12 = vmax.f32 %v403_v1, 0.0 }
  0xf3   :  { %v629_v25 = vpack.c.bf16 %v543_v12, %v542_v18 }
  0xf4   :  { %1451 = vmatmul.msk.bf16.vlgmr.msrb.gmra.mxu3 %vm1450_vm4, %v1780_v4 }
  0xf5   :  { %v2028_v13 = vpop.f32.mrf.mxu3  ;;  %808 = vmatpush.bf16.msra.mxu3 %v1698_v17 }
  0xf6   :  { %v405_v34 = vpop.f32.mrf.mxu0 }
  0xf7   :  { %v406_v61 = vadd.f32 %v405_v34, %v1930_v32 }
  0xf9   :  { %v544_v8 = vmax.f32 %v406_v61, 0.0  ;;  %837 = vmatpush.bf16.msrb.mxu3 %v1699_v56 }
  0xfd   :  { %v520_v63 = vpop.f32.mrf.mxu3 }
  0xfe   :  { %v407_v0 = vpop.f32.mrf.mxu0  ;;  %v521_v40 = vadd.f32 %v520_v63, %v1930_v32 }
  0xff   :  { %v408_v3 = vadd.f32 %v407_v0, %v1930_v32  ;;  %v817_v0 = vld [vmem:[%s2274_s2] sm:$0x1] }
 0x100   :  { %v590_v34 = vmax.f32 %v521_v40, 0.0 }
 0x101   :  { %v545_v10 = vmax.f32 %v408_v3, 0.0 }
 0x103   :  { %v630_v14 = vpack.c.bf16 %v545_v10, %v544_v8 }
 0x104   :  { %1490 = vmatmul.msk.bf16.vlgmr.msra.gmra.mxu3 %vm797_vm5, %v787_v2 }
 0x105   :  { %655 = vmatpush.bf16.msrb.mxu1 %v630_v14  ;;  %v522_v19 = vpop.f32.mrf.mxu3 }
 0x106   :  { %v410_v20 = vpop.f32.mrf.mxu0  ;;  %v523_v52 = vadd.f32 %v522_v19, %v1930_v32 }
 0x107   :  { %v411_v36 = vadd.f32 %v410_v20, %v1930_v32 }
 0x108   :  { %v591_v57 = vmax.f32 %v523_v52, 0.0 }
 0x109   :  { %656 = vmatpush.bf16.msrb.mxu1 %v629_v25  ;;  %v546_v41 = vmax.f32 %v411_v36, 0.0 }
 0x10a   :  { %v653_v8 = vpack.c.bf16 %v591_v57, %v590_v34 }
 0x10d   :  { %657 = vmatpush.bf16.msrb.mxu1 %v628_v29  ;;  %v525_v37 = vpop.f32.mrf.mxu3 }
 0x10e   :  { %v412_v9 = vpop.f32.mrf.mxu0  ;;  %v526_v47 = vadd.f32 %v525_v37, %v1930_v32 }
 0x10f   :  { %v413_v38 = vadd.f32 %v412_v9, %v1930_v32 }
 0x110   :  { %v592_v53 = vmax.f32 %v526_v47, 0.0 }
 0x111   :  { %v547_v44 = vmax.f32 %v413_v38, 0.0  ;;  %658 = vmatpush.bf16.msrb.mxu1 %v627_v39 }
 0x113   :  { %v2060_v45 = vpack.c.bf16 %v547_v44, %v546_v41 }
 0x114   :  { %1495 = vmatmul.msk.bf16.vlgmr.msrb.gmra.mxu3 %vm797_vm5, %v817_v0  ;;  %v1693_v0 = vld [vmem:[%s2275_s3 + $0x28] sm:$0xff] }
 0x115   :  { %659 = vmatpush.bf16.msrb.mxu1 %v1991_v62  ;;  %v527_v46 = vpop.f32.mrf.mxu3  ;;  %v516_v62 = vadd.f32 %v2026_v55, %v1930_v32  ;;  %v511_v55 = vadd.f32 %v2015_v26, %v1930_v32 }
 0x116   :  { %v415_v48 = vpop.f32.mrf.mxu0  ;;  %v528_v51 = vadd.f32 %v527_v46, %v1930_v32 }
 0x117   :  { %v416_v21 = vadd.f32 %v415_v48, %v1930_v32  ;;  %v588_v3 = vmax.f32 %v516_v62, 0.0  ;;  %v586_v11 = vmax.f32 %v511_v55, 0.0  ;;  %v598_v48 = vadd.s32 128, %v2030_v43 }
 0x118   :  { %v593_v54 = vmax.f32 %v528_v51, 0.0 }
 0x119   :  { %660 = vmatpush.bf16.msrb.mxu1 %v1972_v27  ;;  %v518_v27 = vadd.f32 %v2028_v13, %v1930_v32  ;;  %v513_v13 = vadd.f32 %v2024_v49, %v1930_v32  ;;  %vm603_vm14 = vcmp.ge.s32.totalorder %v598_v48, %v2032_v58  ;;  %vm608_vm15 = vcmp.lt.s32.totalorder %v598_v48, %v2036_v60 }
 0x11a   :  { %v654_v59 = vpack.c.bf16 %v593_v54, %v592_v53  ;;  %vm612_vm0 = vmand %vm603_vm14, %vm608_vm15  ;;  %v1696_v54 = vld [vmem:[%s2275_s3 + $0x40] sm:$0xff] }
 0x11b   :  { %v589_v5 = vmax.f32 %v518_v27, 0.0  ;;  %v587_v12 = vmax.f32 %v513_v13, 0.0  ;;  %vm1448_vm1 = vmpackc.low %vm612_vm0, %vm612_vm0  ;;  %v1695_v27 = vld [vmem:[%s2275_s3 + $0x38] sm:$0xff]  ;;  %v1702_v13 = vld [vmem:[%s2275_s3 + $0x70] sm:$0xff] }
 0x11d   :  { %661 = vmatpush.bf16.msrb.mxu1 %v1955_v6  ;;  %v548_v6 = vmax.f32 %v416_v21, 0.0  ;;  %v652_v14 = vpack.c.bf16 %v589_v5, %v588_v3  ;;  %v651_v18 = vpack.c.bf16 %v587_v12, %v586_v11  ;;  %v1705_v21 = vld [vmem:[%s2275_s3 + $0x88] sm:$0xff]  ;;  %v1692_v3 = vld [vmem:[%s2275_s3 + $0x20] sm:$0xff]  ;;  %v1691_v11 = vld [vmem:[%s2275_s3 + $0x18] sm:$0xff] }
 0x11e   :  { %v417_v61 = vpop.f32.mrf.mxu0 }
 0x11f   :  { %v418_v63 = vadd.f32 %v417_v61, %v1930_v32  ;;  %v1694_v61 = vld [vmem:[%s2275_s3 + $0x30] sm:$0xff] }
 0x121   :  { %v549_v1 = vmax.f32 %v418_v63, 0.0  ;;  %662 = vmatpush.bf16.msrb.mxu1 %v1939_v42  ;;  %v1703_v63 = vld [vmem:[%s2275_s3 + $0x78] sm:$0xff] }
 0x123   :  { %v632_v10 = vpack.c.bf16 %v549_v1, %v548_v6 }
 0x124   :  { %1447 = vmatmul.msk.bf16.vlgmr.msrb.gmra.mxu1 %vm1446_vm9, %v1780_v4 }
 0x125   :  { %694 = vmatpush.bf16.msra.mxu1 %v654_v59  ;;  %v1704_v59 = vld [vmem:[%s2275_s3 + $0x80] sm:$0xff] }
 0x126   :  { %v420_v15 = vpop.f32.mrf.mxu0 }
 0x127   :  { %v421_v39 = vadd.f32 %v420_v15, %v1930_v32 }
 0x129   :  { %695 = vmatpush.bf16.msra.mxu1 %v653_v8  ;;  %v550_v46 = vmax.f32 %v421_v39, 0.0  ;;  %v1715_v39 = vld [vmem:[%s2275_s3 + $0xd8] sm:$0xff] }
 0x12a   :  { %1085 = vmatpush.bf16.msra.mxu3 %v1715_v39 }
 0x12d   :  { %696 = vmatpush.bf16.msra.mxu1 %v652_v14 }
 0x12e   :  { %v422_v26 = vpop.f32.mrf.mxu0 }
 0x12f   :  { %v423_v37 = vadd.f32 %v422_v26, %v1930_v32  ;;  %v1700_v26 = vld [vmem:[%s2275_s3 + $0x60] sm:$0xff] }
 0x131   :  { %697 = vmatpush.bf16.msra.mxu1 %v651_v18  ;;  %v551_v41 = vmax.f32 %v423_v37, 0.0  ;;  %v1716_v37 = vld [vmem:[%s2275_s3 + $0xe0] sm:$0xff] }
 0x133   :  { %v633_v47 = vpack.c.bf16 %v551_v41, %v550_v46 }
 0x135   :  { %698 = vmatpush.bf16.msra.mxu1 %v2010_v22 }
 0x136   :  { %v425_v42 = vpop.f32.mrf.mxu0 }
 0x137   :  { %v426_v35 = vadd.f32 %v425_v42, %v1930_v32  ;;  %v1690_v42 = vld [vmem:[%s2275_s3 + $0x10] sm:$0xff] }
 0x139   :  { %699 = vmatpush.bf16.msra.mxu1 %v2000_v7  ;;  %v600_v7 = vadd.s32 384, %v2030_v43  ;;  %v552_v2 = vmax.f32 %v426_v35, 0.0  ;;  %v820_v43 = vperm.slane %v1924_v28, 3  ;;  %v1718_v35 = vld [vmem:[%s2275_s3 + $0xf0] sm:$0xff] }
 0x13b   :  { %vm605_vm10 = vcmp.ge.s32.totalorder %v600_v7, %v2032_v58  ;;  %vm610_vm11 = vcmp.lt.s32.totalorder %v600_v7, %v2036_v60  ;;  %v1707_v58 = vld [vmem:[%s2275_s3 + $0x98] sm:$0xff]  ;;  %v1697_v60 = vld [vmem:[%s2275_s3 + $0x48] sm:$0xff]  ;;  %v1722_v7 = vld [vmem:[%s2275_s3 + $0x110] sm:$0xff] }
 0x13c   :  { %vm614_vm12 = vmand %vm605_vm10, %vm610_vm11 }
 0x13d   :  { %700 = vmatpush.bf16.msra.mxu1 %v1986_v50  ;;  %vm1452_vm13 = vmpackc.low %vm614_vm12, %vm614_vm12 }
 0x13e   :  { %v427_v49 = vpop.f32.mrf.mxu0 }
 0x13f   :  { %v428_v33 = vadd.f32 %v427_v49, %v1930_v32  ;;  %v1723_v49 = vld [vmem:[%s2275_s3 + $0x118] sm:$0xff] }
 0x141   :  { %701 = vmatpush.bf16.msra.mxu1 %v1964_v16  ;;  %v553_v9 = vmax.f32 %v428_v33, 0.0  ;;  %v1720_v33 = vld [vmem:[%s2275_s3 + $0x100] sm:$0xff] }
 0x143   :  { %v634_v44 = vpack.c.bf16 %v553_v9, %v552_v2  ;;  %v1731_v9 = vld [vmem:[%s2275_s3 + $0x158] sm:$0xff]  ;;  %v1729_v2 = vld [vmem:[%s2275_s3 + $0x148] sm:$0xff] }
 0x144   :  { %1453 = vmatmul.msk.bf16.vlgmr.msra.gmra.mxu1 %vm1452_vm13, %v1780_v4 }
 0x145   :  { %929 = vmatpush.bf16.msrb.mxu1 %v1707_v58 }
 0x146   :  { %v430_v19 = vpop.f32.mrf.mxu0 }
 0x147   :  { %v431_v25 = vadd.f32 %v430_v19, %v1930_v32 }
 0x149   :  { %v554_v36 = vmax.f32 %v431_v25, 0.0 }
 0x14e   :  { %v432_v20 = vpop.f32.mrf.mxu0 }
 0x14f   :  { %v433_v23 = vadd.f32 %v432_v20, %v1930_v32 }
 0x151   :  { %v555_v29 = vmax.f32 %v433_v23, 0.0 }
 0x153   :  { %v635_v38 = vpack.c.bf16 %v555_v29, %v554_v36  ;;  %v1717_v36 = vld [vmem:[%s2275_s3 + $0xe8] sm:$0xff] }
 0x156   :  { %v435_v22 = vpop.f32.mrf.mxu0 }
 0x157   :  { %v436_v16 = vadd.f32 %v435_v22, %v1930_v32 }
 0x159   :  { %v556_v30 = vmax.f32 %v436_v16, 0.0 }
 0x15e   :  { %v437_v50 = vpop.f32.mrf.mxu0 }
 0x15f   :  { %v438_v24 = vadd.f32 %v437_v50, %v1930_v32 }
 0x161   :  { %v557_v31 = vmax.f32 %v438_v24, 0.0 }
 0x163   :  { %v636_v17 = vpack.c.bf16 %v557_v31, %v556_v30  ;;  %v1721_v31 = vld [vmem:[%s2275_s3 + $0x108] sm:$0xff] }
 0x165   :  { %670 = vmatpush.bf16.msrb.mxu2 %v636_v17  ;;  %v1719_v17 = vld [vmem:[%s2275_s3 + $0xf8] sm:$0xff] }
 0x169   :  { %671 = vmatpush.bf16.msrb.mxu2 %v635_v38  ;;  %v1730_v38 = vld [vmem:[%s2275_s3 + $0x150] sm:$0xff] }
 0x16d   :  { %672 = vmatpush.bf16.msrb.mxu2 %v634_v44 }
 0x171   :  { %673 = vmatpush.bf16.msrb.mxu2 %v633_v47  ;;  %v1728_v47 = vld [vmem:[%s2275_s3 + $0x140] sm:$0xff] }
 0x175   :  { %674 = vmatpush.bf16.msrb.mxu2 %v632_v10  ;;  %v1701_v10 = vld [vmem:[%s2275_s3 + $0x68] sm:$0xff] }
 0x177   :  { %v2113_v32 = vpop.f32.mrf.mxu3 }
 0x179   :  { %675 = vmatpush.bf16.msrb.mxu2 %v2060_v45 }
 0x17c   :  { %1449 = vmatmul.msk.bf16.vlgmr.msrb.gmra.mxu2 %vm1448_vm1, %v1780_v4  ;;  %v1706_v4 = vld [vmem:[%s2275_s3 + $0x90] sm:$0xff] }
 0x17d   :  { %773 = vmatpush.bf16.msra.mxu2 %v1697_v60  ;;  %930 = vmatpush.bf16.msrb.mxu1 %v1706_v4 }
 0x17f   :  { %v692_v51 = vpop.f32.mrf.mxu3 }
 0x181   :  { %774 = vmatpush.bf16.msra.mxu2 %v1696_v54  ;;  %931 = vmatpush.bf16.msrb.mxu1 %v1705_v21  ;;  %v1712_v21 = vld [vmem:[%s2275_s3 + $0xc0] sm:$0xff] }
 0x185   :  { %775 = vmatpush.bf16.msra.mxu2 %v1695_v27  ;;  %932 = vmatpush.bf16.msrb.mxu1 %v1704_v59  ;;  %v1711_v27 = vld [vmem:[%s2275_s3 + $0xb8] sm:$0xff] }
 0x187   :  { %v2115_v40 = vpop.f32.mrf.mxu3 }
 0x189   :  { %776 = vmatpush.bf16.msra.mxu2 %v1694_v61  ;;  %933 = vmatpush.bf16.msrb.mxu1 %v1703_v63 }
 0x18d   :  { %777 = vmatpush.bf16.msra.mxu2 %v1693_v0  ;;  %934 = vmatpush.bf16.msrb.mxu1 %v1702_v13 }
 0x18f   :  { %v812_v52 = vpop.f32.mrf.mxu3 }
 0x190   :  { %v1727_v52 = vld [vmem:[%s2275_s3 + $0x138] sm:$0xff] }
 0x191   :  { %778 = vmatpush.bf16.msra.mxu2 %v1692_v3  ;;  %935 = vmatpush.bf16.msrb.mxu1 %v1701_v10 }
 0x195   :  { %779 = vmatpush.bf16.msra.mxu2 %v1691_v11  ;;  %936 = vmatpush.bf16.msrb.mxu1 %v1700_v26  ;;  %v1736_v26 = vld [vmem:[%s2275_s3 + $0x180] sm:$0xff] }
 0x197   :  { %v839_v45 = vpop.f32.mrf.mxu3 }
 0x198   :  { %v840_v53 = vadd.f32 %v839_v45, %v820_v43  ;;  %v790_v43 = vperm.slane %v1924_v28, 2  ;;  %v1725_v45 = vld [vmem:[%s2275_s3 + $0x128] sm:$0xff] }
 0x199   :  { %780 = vmatpush.bf16.msra.mxu2 %v1690_v42  ;;  %1163 = vmatpush.bf16.msra.mxu1 %v1731_v9  ;;  %v1735_v42 = vld [vmem:[%s2275_s3 + $0x178] sm:$0xff] }
 0x19a   :  { %v846_v56 = vand.u32 2147483647, %v840_v53  ;;  %v843_v15 = vmax.f32 %v840_v53, 0.0  ;;  %vm844_vm3 = vcmp.ne.f32.partialorder %v840_v53, %v840_v53  ;;  %v811_v60 = vadd.f32 %v2115_v40, %v790_v43  ;;  %v1713_v40 = vld [vmem:[%s2275_s3 + $0xc8] sm:$0xff] }
 0x19c   :  { %v847_v62 = vsub.f32 0.0, %v846_v56  ;;  %vm814_vm4 = vcmp.ge.f32.partialorder %v811_v60, 0.0  ;;  %v1714_v56 = vld [vmem:[%s2275_s3 + $0xd0] sm:$0xff] }
 0x19d   :  { %1024 = vmatpush.bf16.msrb.mxu2 %v1723_v49  ;;  %1164 = vmatpush.bf16.msra.mxu1 %v1730_v38 }
 0x19e   :  { %v848_v34 = vmul.f32 1.442695, %v847_v62  ;;  %v1724_v62 = vld [vmem:[%s2275_s3 + $0x120] sm:$0xff]  ;;  %1086 = vmatpush.bf16.msra.mxu3 %v1714_v56 }
 0x19f   :  { %v841_v57 = vpop.f32.mrf.mxu3 }
 0x1a0   :  { %1748 = vpow2.f32 %v848_v34  ;;  %v1710_v34 = vld [vmem:[%s2275_s3 + $0xb0] sm:$0xff]  ;;  %v880_v57 = vperm.slane %v1924_v28, 4 }
 0x1a1   :  { %1025 = vmatpush.bf16.msrb.mxu2 %v1722_v7  ;;  %v664_v23 = vpop.f32.mrf.mxu1  ;;  %1165 = vmatpush.bf16.msra.mxu1 %v1729_v2  ;;  %v1732_v7 = vld [vmem:[%s2275_s3 + $0x160] sm:$0xff] }
 0x1a2   :  { %1087 = vmatpush.bf16.msra.mxu3 %v1713_v40 }
 0x1a5   :  { %1026 = vmatpush.bf16.msrb.mxu2 %v1721_v31  ;;  %1166 = vmatpush.bf16.msra.mxu1 %v1728_v47 }
 0x1a6   :  { %v1749_v55 = vpop.eup %1748  ;;  %1088 = vmatpush.bf16.msra.mxu3 %v1712_v21 }
 0x1a7   :  { %v850_v6 = vadd.f32 1.0, %v1749_v55  ;;  %v853_v1 = vmul.f32 -0.5, %v1749_v55  ;;  %v856_v8 = vand.u32 2147483647, %v1749_v55 }
 0x1a9   :  { %1750 = vlog2.f32 %v850_v6  ;;  %v854_v5 = vadd.f32 1.0, %v853_v1  ;;  %vm857_vm2 = vcmp.lt.f32.partialorder %v856_v8, 0.0004427343  ;;  %v666_v25 = vpop.f32.mrf.mxu1  ;;  %1027 = vmatpush.bf16.msrb.mxu2 %v1720_v33  ;;  %1167 = vmatpush.bf16.msra.mxu1 %v1727_v52  ;;  %v1708_v6 = vld [vmem:[%s2275_s3 + $0xa0] sm:$0xff]  ;;  %v724_v1 = vperm.slane %v1924_v28, 1 }
 0x1aa   :  { %1089 = vmatpush.bf16.msra.mxu3 %v1711_v27 }
 0x1ab   :  { %v855_v12 = vmul.f32 %v1749_v55, %v854_v5  ;;  %v1709_v55 = vld [vmem:[%s2275_s3 + $0xa8] sm:$0xff] }
 0x1ad   :  { %1028 = vmatpush.bf16.msrb.mxu2 %v1719_v17  ;;  %v1199_v17 = vperm.slane %v1924_v28, 6 }
 0x1ae   :  { %1090 = vmatpush.bf16.msra.mxu3 %v1710_v34 }
 0x1af   :  { %v1751_v14 = vpop.eup %1750 }
 0x1b0   :  { %v852_v18 = vmul.f32 0.6931472, %v1751_v14  ;;  %v1739_v14 = vld [vmem:[%s2275_s3 + $0x198] sm:$0xff] }
 0x1b1   :  { %1029 = vmatpush.bf16.msrb.mxu2 %v1718_v35 }
 0x1b2   :  { %v858_v19 = vsel %vm857_vm2, %v855_v12, %v852_v18  ;;  %1091 = vmatpush.bf16.msra.mxu3 %v1709_v55  ;;  %v1737_v18 = vld [vmem:[%s2275_s3 + $0x188] sm:$0xff] }
 0x1b3   :  { %v859_v20 = vadd.f32 %v858_v19, %v843_v15  ;;  %v1738_v15 = vld [vmem:[%s2275_s3 + $0x190] sm:$0xff] }
 0x1b5   :  { %v860_v22 = vsel %vm844_vm3, %v840_v53, %v859_v20  ;;  %1030 = vmatpush.bf16.msrb.mxu2 %v1717_v36  ;;  %v1734_v20 = vld [vmem:[%s2275_s3 + $0x170] sm:$0xff] }
 0x1b6   :  { %1752 = vtanh.f32 %v860_v22  ;;  %1092 = vmatpush.bf16.msra.mxu3 %v1708_v6  ;;  %v1733_v22 = vld [vmem:[%s2275_s3 + $0x168] sm:$0xff] }
 0x1b9   :  { %1031 = vmatpush.bf16.msrb.mxu2 %v1716_v37 }
 0x1bc   :  { %v1753_v16 = vpop.eup %1752 }
 0x1bd   :  { %v862_v50 = vmul.f32 %v1753_v16, %v840_v53  ;;  %v815_v53 = vmul.f32 0.01, %v811_v60 }
 0x1bf   :  { %v863_v24 = vpack.c.bf16 %v862_v50, %v862_v50  ;;  %v816_v4 = vsel %vm814_vm4, %v811_v60, %v815_v53 }
 0x1c0   :  { %v959_v54 = vpack.c.bf16 %v816_v4, %v816_v4 }
 0x1c1   :  { %937 = vmatmul.bf16.vlgmr.msrb.gmra.mxu1 %v863_v24  ;;  %v703_v30 = vpop.f32.mrf.mxu1 }
 0x1c9   :  { %v705_v29 = vpop.f32.mrf.mxu1 }
 0x1ff   :  { %v677_v41 = vpop.f32.mrf.mxu2 }
 0x200   :  { %v678_v44 = vadd.f32 %v677_v41, %v664_v23  ;;  %v1177_v23 = vperm.slane %v1924_v28, 5 }
 0x202   :  { %v691_v46 = vadd.f32 %v2113_v32, %v678_v44  ;;  %v1726_v32 = vld [vmem:[%s2275_s3 + $0x130] sm:$0xff]  ;;  %s1269_s3 = sshll.u32 %s2277_s5, 4  ;;  %s1270_s3 = int_to_ptr.hbm [resolvable:$true] %s1269_s3 }
 0x203   :  { %1168 = vmatpush.bf16.msra.mxu1 %v1726_v32 }
 0x204   :  { %v704_v48 = vadd.f32 %v703_v30, %v691_v46 }
 0x206   :  { %v707_v51 = vpack.c.bf16 %v704_v48, %v704_v48 }
 0x207   :  { %v679_v58 = vpop.f32.mrf.mxu2  ;;  %1169 = vmatpush.bf16.msra.mxu1 %v1725_v45 }
 0x208   :  { %781 = vmatmul.bf16.vlgmr.msra.gmra.mxu2 %v707_v51 }
 0x209   :  { %1248 = vmatpush.bf16.msra.mxu2 %v1739_v14 }
 0x20b   :  { %1170 = vmatpush.bf16.msra.mxu1 %v1724_v62 }
 0x20d   :  { %1249 = vmatpush.bf16.msra.mxu2 %v1738_v15 }
 0x211   :  { %1250 = vmatpush.bf16.msra.mxu2 %v1737_v18 }
 0x215   :  { %1251 = vmatpush.bf16.msra.mxu2 %v1736_v26 }
 0x218   :  { %1032 = vmatmul.bf16.vlgmr.msrb.gmra.mxu2 %v959_v54 }
 0x219   :  { %1252 = vmatpush.bf16.msra.mxu2 %v1735_v42 }
 0x21d   :  { %1253 = vmatpush.bf16.msra.mxu2 %v1734_v20 }
 0x221   :  { %1254 = vmatpush.bf16.msra.mxu2 %v1733_v22 }
 0x225   :  { %1255 = vmatpush.bf16.msra.mxu2 %v1732_v7 }
 0x23e   :  { %v938_v59 = vpop.f32.mrf.mxu1 }
 0x23f   :  { %v939_v61 = vadd.f32 %v938_v59, %v880_v57 }
 0x241   :  { %v1098_v63 = vpack.c.bf16 %v939_v61, %v939_v61 }
 0x243   :  { %1171 = vmatmul.bf16.vlgmr.msra.gmra.mxu1 %v1098_v63 }
 0x246   :  { %v940_v0 = vpop.f32.mrf.mxu1 }
 0x28b   :  { %v782_v13 = vpop.f32.mrf.mxu2 }
 0x28c   :  { %v783_v3 = vadd.f32 %v782_v13, %v724_v1 }
 0x28e   :  { %v786_v5 = vmax.f32 %v783_v3, 0.0 }
 0x290   :  { %v942_v8 = vpack.c.bf16 %v786_v5, %v786_v5 }
 0x292   :  { %1093 = vmatmul.bf16.vlgmr.msra.gmra.mxu3 %v942_v8 }
 0x293   :  { %v784_v10 = vpop.f32.mrf.mxu2 }
 0x29b   :  { %v1033_v11 = vpop.f32.mrf.mxu2 }
 0x2a3   :  { %v1035_v12 = vpop.f32.mrf.mxu2 }
 0x2c0   :  { %v1172_v49 = vpop.f32.mrf.mxu1 }
 0x2c8   :  { %v1174_v19 = vpop.f32.mrf.mxu1 }
 0x315   :  { %v1094_v16 = vpop.f32.mrf.mxu3 }
 0x316   :  { %v1095_v50 = vadd.f32 %v1094_v16, %v1033_v11 }
 0x318   :  { %v1176_v24 = vadd.f32 %v1172_v49, %v1095_v50 }
 0x31a   :  { %v1178_v25 = vadd.f32 %v1177_v23, %v1176_v24 }
 0x31c   :  { %vm1179_vm5 = vcmp.ge.f32.partialorder %v1178_v25, 0.0  ;;  %v1180_v30 = vmul.f32 0.01, %v1178_v25 }
 0x31d   :  { %v1096_v31 = vpop.f32.mrf.mxu3 }
 0x31e   :  { %v1181_v33 = vsel %vm1179_vm5, %v1178_v25, %v1180_v30 }
 0x31f   :  { %v1182_v29 = vpack.c.bf16 %v1181_v33, %v1181_v33 }
 0x321   :  { %1256 = vmatmul.bf16.vlgmr.msra.gmra.mxu2 %v1182_v29 }
 0x3a4   :  { %v1257_v35 = vpop.f32.mrf.mxu2 }
 0x3a5   :  { %v1258_v36 = vadd.f32 %v1257_v35, %v1199_v17 }
 0x3a7   :  { %1261 = vst [vmem:[#allocation2] sm:$0x3] %v1258_v36 }
 0x3a8   :  { %1272 = dma.vmem_to_hbm [thread:$0]  %s1268_s27, 32, %s1270_s3, [#allocation3]  }
 0x3ac   :  { %v1259_v37 = vpop.f32.mrf.mxu2 }
 0x3ad   :  { %1778 = dma.done.wait [#allocation3], 32  }
 0x3ae   :  { %1779 = vsyncadd [#allocation3], 4294967264 }
 0x3af   :  { %1277 = vsyncpa [#allocation3], 1 }

</bundles_post_ra>
